<compile_context>
chip_gen: v7x
topology: tpu7x:2x2x1
jax: 0.10.0
libtpu: 0.0.40
codegen_flags: <defaults>
</compile_context>

<pallas_src>
import jax
import jax.numpy as jnp
from jax import lax
from jax.experimental import pallas as pl
from jax.experimental.pallas import tpu as pltpu

HIDDEN = 24  # fixed by the module: nn.Linear(state_size, 24)

# Gridless as long as the padded VMEM working set stays ~<= 8 MiB
# (~256 bytes / batch column: x^T padded 9->16 rows + h 24 rows + out 4->8
# rows, f32), which fits v5e's 16 MiB default scoped VMEM with headroom and
# is trivial on v6e/v7x.
GRIDLESS_MAX_B = 32768


def qnetwork_kernel(x_ref, w1_ref, w2_ref, b2_ref, o_ref):
    # x_ref : (S+1, TB) batch-in-lanes, trailing ones row folds the fc1 bias
    # w1_ref: (H, S+1)  fc1.weight with fc1.bias appended as last column
    # w2_ref: (A, H)    fc2.weight (PyTorch layout)
    # b2_ref: (A, 1)    fc2.bias, broadcast over the lane (batch) axis
    h = jnp.dot(w1_ref[...], x_ref[...],
                preferred_element_type=jnp.float32,
                precision=lax.Precision.HIGHEST)          # (H, TB), bias folded
    h = jnp.maximum(h, 0.0)                               # ReLU on VPU
    out = jnp.dot(w2_ref[...], h,
                  preferred_element_type=jnp.float32,
                  precision=lax.Precision.HIGHEST) + b2_ref[...]   # (A, TB)
    o_ref[...] = out.astype(o_ref.dtype)


def _round_up(x, m):
    return ((x + m - 1) // m) * m


def _round_down(x, m):
    return (x // m) * m


def _cost_estimate(B, S, H, A):
    flops = 2 * B * (S + 1) * H + 2 * B * H * A
    bytes_accessed = 4 * ((S + 1) * B + H * (S + 1) + A * H + A + A * B)
    return pl.CostEstimate(flops=flops, transcendentals=0,
                           bytes_accessed=bytes_accessed)


def pack_params(w1, b1, w2, b2):
    """One-time parameter prep.

    w1: (H, S) fc1.weight, b1: (H,) fc1.bias,
    w2: (A, H) fc2.weight, b2: (A,) fc2.bias   (all PyTorch layout).
    """
    w1_aug = jnp.concatenate([w1, b1[:, None]], axis=1)   # (H, S+1)
    b2_col = b2[:, None]                                   # (A, 1)
    return w1_aug, w2, b2_col


def qnetwork_forward(x, w1_aug, w2, b2_col, *, force_tiled=False):
    """x: (B, S) -> (B, A), matching QNetwork.forward."""
    B, S = x.shape
    H, Sp1 = w1_aug.shape
    A = w2.shape[0]
    assert Sp1 == S + 1 and H == w2.shape[1]

    # Batch-in-lanes view with a ones row to fold the fc1 bias (layout plumbing).
    x_aug_t = jnp.concatenate([x, jnp.ones((B, 1), x.dtype)], axis=1).T  # (S+1, B)

    cost = _cost_estimate(B, S, H, A)

    if B <= GRIDLESS_MAX_B and not force_tiled:
        # Gridless: whole problem VMEM-resident, no pipeline prologue/epilogue.
        out_t = pl.pallas_call(
            qnetwork_kernel,
            out_shape=jax.ShapeDtypeStruct((A, B), jnp.float32),
            in_specs=[pl.BlockSpec(memory_space=pltpu.MemorySpace.VMEM)] * 4,
            out_specs=pl.BlockSpec(memory_space=pltpu.MemorySpace.VMEM),
            cost_estimate=cost,
        )(x_aug_t, w1_aug, w2, b2_col)
        return out_t.T

    # Very-large-batch path: tile the batch (lane) axis only; weights stay
    # full-extent.  TB is a multiple of 128 sized for >= 8 grid steps
    # (>= 4 per v7x TensorCore) so the "parallel" axis actually overlaps.
    TB = max(512, min(8192, _round_down(max(B // 8, 128), 128)))
    Bp = _round_up(B, TB)
    if Bp != B:
        x_aug_t = jnp.pad(x_aug_t, ((0, 0), (0, Bp - B)))

    out_t = pl.pallas_call(
        qnetwork_kernel,
        out_shape=jax.ShapeDtypeStruct((A, Bp), jnp.float32),
        grid=(Bp // TB,),
        in_specs=[
            pl.BlockSpec((S + 1, TB), lambda i: (0, i)),
            pl.BlockSpec((H, S + 1), lambda i: (0, 0)),
            pl.BlockSpec((A, H), lambda i: (0, 0)),
            pl.BlockSpec((A, 1), lambda i: (0, 0)),
        ],
        out_specs=pl.BlockSpec((A, TB), lambda i: (0, i)),
        compiler_params=pltpu.CompilerParams(
            dimension_semantics=("parallel",),
            vmem_limit_bytes=32 << 20),   # explicit, with headroom on v7x's 64 MiB
        cost_estimate=cost,
    )(x_aug_t, w1_aug, w2, b2_col)
    return out_t[:, :B].T


def init_params(key, state_size, hidden, action_size):
    # Deterministic synthetic init (PyTorch-style uniform fan-in bounds),
    # weights in native PyTorch layout: fc.weight is (out, in).
    k1, k2, k3, k4 = jax.random.split(key, 4)
    bound1 = 1.0 / jnp.sqrt(jnp.float32(state_size))
    bound2 = 1.0 / jnp.sqrt(jnp.float32(hidden))
    w1 = jax.random.uniform(k1, (hidden, state_size), jnp.float32, -bound1, bound1)
    b1 = jax.random.uniform(k2, (hidden,), jnp.float32, -bound1, bound1)
    w2 = jax.random.uniform(k3, (action_size, hidden), jnp.float32, -bound2, bound2)
    b2 = jax.random.uniform(k4, (action_size,), jnp.float32, -bound2, bound2)
    return w1, b1, w2, b2


def _reference(x, w1, b1, w2, b2):
    # y = relu(x @ W1^T + b1) @ W2^T + b2  (nn.Linear semantics)
    h = jnp.maximum(x @ w1.T + b1, 0.0)
    return h @ w2.T + b2


if __name__ == "__main__":
    state_size = 8
    action_size = 4

    key = jax.random.PRNGKey(0)
    kx, kp, kxb, kxt = jax.random.split(key, 4)
    w1, b1, w2, b2 = init_params(kp, state_size, HIDDEN, action_size)
    w1_aug, w2_p, b2_col = pack_params(w1, b1, w2, b2)

    # ---- tiny-batch case (B=2): gridless path ----
    x_small = jax.random.normal(kx, (2, state_size), dtype=jnp.float32)
    out_small = jax.block_until_ready(qnetwork_forward(x_small, w1_aug, w2_p, b2_col))
    ref_small = _reference(x_small, w1, b1, w2, b2)
    assert out_small.shape == (2, action_size)
    assert jnp.allclose(out_small, ref_small, atol=1e-5, rtol=1e-5)

    # ---- batched case (B=1024): now also gridless (well under VMEM ceiling) ----
    x_big = jax.random.normal(kxb, (1024, state_size), dtype=jnp.float32)
    out_big = jax.block_until_ready(qnetwork_forward(x_big, w1_aug, w2_p, b2_col))
    ref_big = _reference(x_big, w1, b1, w2, b2)
    assert out_big.shape == (1024, action_size)
    assert jnp.allclose(out_big, ref_big, atol=1e-4, rtol=1e-4)

    # ---- very-large-batch path (forced): batch-tiled, "parallel" grid axis ----
    x_tiled = jax.random.normal(kxt, (2048, state_size), dtype=jnp.float32)
    out_tiled = jax.block_until_ready(
        qnetwork_forward(x_tiled, w1_aug, w2_p, b2_col, force_tiled=True))
    ref_tiled = _reference(x_tiled, w1, b1, w2, b2)
    assert out_tiled.shape == (2048, action_size)
    assert jnp.allclose(out_tiled, ref_tiled, atol=1e-4, rtol=1e-4)

    print("KERNEL_OK")
</pallas_src>

<mosaic_0001>
module attributes {stable_mosaic.version = 11 : i64} {
  func.func @qnetwork_kernel(%arg0: memref<9x2xf32, #tpu.memory_space<vmem>>, %arg1: memref<24x9xf32, #tpu.memory_space<vmem>>, %arg2: memref<4x24xf32, #tpu.memory_space<vmem>>, %arg3: memref<4x1xf32, #tpu.memory_space<vmem>>, %arg4: memref<4x2xf32, #tpu.memory_space<vmem>>) attributes {dimension_semantics = [], scalar_prefetch = 0 : i64, scratch_operands = 0 : i64, tpu.core_type = #tpu.core_type<tc>} {
    %c0 = arith.constant 0 : index
    %c0_0 = arith.constant 0 : index
    %0 = vector.load %arg1[%c0, %c0_0] : memref<24x9xf32, #tpu.memory_space<vmem>>, vector<24x9xf32>
    %c0_1 = arith.constant 0 : index
    %c0_2 = arith.constant 0 : index
    %1 = vector.load %arg0[%c0_1, %c0_2] : memref<9x2xf32, #tpu.memory_space<vmem>>, vector<9x2xf32>
    %cst = arith.constant dense<0.000000e+00> : vector<24x2xf32>
    %2 = tpu.matmul %0, %1, %cst {dimension_numbers = #tpu.dot_dimension_numbers<[1], [0], [0], [1], [0, 0, 1, 1], [], []>, precision = #tpu.contract_precision<fp32>} : vector<24x9xf32>, vector<9x2xf32>, vector<24x2xf32> -> vector<24x2xf32>
    %cst_3 = arith.constant 0.000000e+00 : f32
    %3 = vector.broadcast %cst_3 : f32 to vector<24x2xf32>
    %4 = arith.maximumf %2, %3 : vector<24x2xf32>
    %c0_4 = arith.constant 0 : index
    %c0_5 = arith.constant 0 : index
    %5 = vector.load %arg2[%c0_4, %c0_5] : memref<4x24xf32, #tpu.memory_space<vmem>>, vector<4x24xf32>
    %cst_6 = arith.constant dense<0.000000e+00> : vector<4x2xf32>
    %6 = tpu.matmul %5, %4, %cst_6 {dimension_numbers = #tpu.dot_dimension_numbers<[1], [0], [0], [1], [0, 0, 1, 1], [], []>, precision = #tpu.contract_precision<fp32>} : vector<4x24xf32>, vector<24x2xf32>, vector<4x2xf32> -> vector<4x2xf32>
    %c0_7 = arith.constant 0 : index
    %c0_8 = arith.constant 0 : index
    %7 = vector.load %arg3[%c0_7, %c0_8] : memref<4x1xf32, #tpu.memory_space<vmem>>, vector<4x1xf32>
    %8 = vector.broadcast %7 : vector<4x1xf32> to vector<4x2xf32>
    %9 = arith.addf %6, %8 : vector<4x2xf32>
    %c0_9 = arith.constant 0 : index
    %c0_10 = arith.constant 0 : index
    %10 = vector.load %arg4[%c0_9, %c0_10] : memref<4x2xf32, #tpu.memory_space<vmem>>, vector<4x2xf32>
    tpu.vector_store %arg4[%c0_9, %c0_10], %9 {strides = array<i32>} : memref<4x2xf32, #tpu.memory_space<vmem>>, vector<4x2xf32>,
    return
  }
}

</mosaic_0001>

<bundles_post_ra>
// kernel: tpu_custom_call.1
= control target key start
LH: loop header
LB: loop body
LE: loop exit
PB: predicated region body
PF: predicated region fallthrough
CT: control target
= control target key end

     0   :  { %vm32_vm0 = vcmask 1040384   ;;  %v1340_v0 = vmov 0.0|0.0   ;;  %vm1341_vm1 = vmmov 0   ;;  %v1342_v3 = vmov 0.0   ;;  %s1484_s0 = inlined_call_operand.vmem [shape: f32[9,2], index: 0, kind: input, shape index: {}]   ;;  %s1485_s1 = inlined_call_operand.vmem [shape: f32[24,9], index: 1, kind: input, shape index: {}]   ;;  %s1486_s3 = inlined_call_operand.vmem [shape: f32[4,1], index: 3, kind: input, shape index: {}]   ;;  %s1487_s2 = inlined_call_operand.vmem [shape: f32[4,24], index: 2, kind: input, shape index: {}]   ;;  %s1488_s4 = inlined_call_operand.vmem [shape: f32[4,2], index: 4, kind: output, shape index: {}]  }
   0x1   :  { %1262 = vmatprep.subr.bf16.mxu0 %v1340_v0  ;;  %v20_v1 = vld [vmem:[%s1484_s0] sm:$0xff]  ;;  %v21_v2 = vld [vmem:[%s1484_s0 + $0x8] sm:$0x1]  ;;  %1144 = vmatprep.mubr.msk.f32.mxu0 %vm1341_vm1, %v1342_v3  ;;  %vm22_vm2 = vcmask 72704   ;;  %v19_v9 = vld [vmem:[%s1485_s1 + $0x10] sm:$0xff]  ;;  %v1343_v40 = vmov 0  }
   0x2   :  { %v17_v4 = vld [vmem:[%s1485_s1] sm:$0xff]  ;;  %v34_v5 = vsel %vm32_vm0, %v21_v2, 0  ;;  %v37_v6 = vand.u32 4294901760, %v20_v1  ;;  %v18_v8 = vld [vmem:[%s1485_s1 + $0x8] sm:$0xff]  ;;  %1259 = vmatprep.subr.bf16.mxu1 %v1340_v0  ;;  %1131 = vmatprep.mubr.msk.f32.mxu1 %vm1341_vm1, %v1342_v3  ;;  %v30_v13 = vsel %vm22_vm2, %v19_v9, 0  ;;  %vm591_vm3 = vcmask 195584  }
   0x3   :  { %v24_v7 = vsel %vm22_vm2, %v17_v4, 0  ;;  %v40_v10 = vand.u32 4294901760, %v34_v5  ;;  %v27_v12 = vsel %vm22_vm2, %v18_v8, 0  ;;  %v1395_v19 = vand.u32 4294901760, %v30_v13  ;;  %1339 = vset.pattern.permute.xlu0 %v1343_v40  ;;  %v585_v41 = vld [vmem:[%s1486_s3] sm:$0xf] }
   0x4   :  { %v1390_v11 = vand.u32 4294901760, %v24_v7  ;;  %v135_v14 = vsub.f32 %v20_v1, %v37_v6  ;;  %v1392_v15 = vand.u32 4294901760, %v27_v12  ;;  %588 = vperm.xlu0 %1339, %v585_v41   ;;  %v584_v48 = vld [vmem:[%s1487_s2] sm:$0xf]  ;;  %vm1067_vm4 = vcmask 11264  }
   0x5   :  { %v142_v16 = vsub.f32 %v34_v5, %v40_v10  ;;  %v1260_v18 = vpack.c.bf16 %v40_v10, %v37_v6  ;;  %v124_v27 = vsub.f32 %v30_v13, %v1395_v19  ;;  %v593_v49 = vsel %vm591_vm3, %v584_v48, 0 }
   0x6   :  { %v104_v17 = vsub.f32 %v24_v7, %v1390_v11  ;;  %v136_v20 = vand.u32 4294901760, %v135_v14  ;;  %v114_v21 = vsub.f32 %v27_v12, %v1392_v15  ;;  %v1454_v50 = vand.u32 4294901760, %v593_v49 }
   0x7   :  { %v143_v22 = vand.u32 4294901760, %v142_v16  ;;  %1261 = vmatpush3.bf16.msra.mxu1 %v1260_v18  ;;  %v125_v33 = vand.u32 4294901760, %v124_v27  ;;  %v1266_v37 = vpack.c.bf16 %v142_v16, %v135_v14 }
   0x8   :  { %v105_v23 = vand.u32 4294901760, %v104_v17  ;;  %v137_v24 = vsub.f32 %v135_v14, %v136_v20  ;;  %v115_v25 = vand.u32 4294901760, %v114_v21  ;;  %1295 = vmatprep.subr.bf16.mxu1 %v1340_v0  ;;  %v664_v54 = vsub.f32 %v593_v49, %v1454_v50 }
   0x9   :  { %v144_v26 = vsub.f32 %v142_v16, %v143_v22  ;;  %v126_v36 = vsub.f32 %v124_v27, %v125_v33  ;;  %v1272_v39 = vpack.c.bf16 %v143_v22, %v136_v20 }
   0xa   :  { %v106_v28 = vsub.f32 %v104_v17, %v105_v23  ;;  %v138_v29 = vand.u32 4294901760, %v137_v24  ;;  %v116_v30 = vsub.f32 %v114_v21, %v115_v25  ;;  %v665_v60 = vand.u32 4294901760, %v664_v54 }
   0xb   :  { %v145_v31 = vand.u32 4294901760, %v144_v26  ;;  %v127_v38 = vand.u32 4294901760, %v126_v36 }
   0xc   :  { %v107_v32 = vand.u32 4294901760, %v106_v28  ;;  %v117_v35 = vand.u32 4294901760, %v116_v30  ;;  %v666_v6 = vsub.f32 %v664_v54, %v665_v60 }
   0xd   :  { %v1263_v34 = vpack.c.bf16 %v145_v31, %v138_v29 }
   0xe   :  { %1132 = vmatmul.mubr.f32.vlgmr.msra.gmra.mrb[0].mxu1 %v107_v32  ;;  %v667_v14 = vand.u32 4294901760, %v666_v6 }
   0xf   :  { %1134 = vmatprep.mubr.msk.f32.mxu1 %vm1341_vm1, %v1342_v3  ;;  %1264 = vmatpush3.bf16.msra.mxu0 %v1263_v34 }
  0x10   :  { %1296 = vmatpush3.bf16.msra.mxu1 %v1263_v34  ;;  %1265 = vmatprep.subr.bf16.mxu0 %v1340_v0 }
  0x11   :  { %1277 = vmatprep.subr.bf16.mxu1 %v1340_v0 }
  0x12   :  { %1135 = vmatmul.mubr.f32.gmra.mrb[2].mxu1 %v117_v35  ;;  %1145 = vmatmul.mubr.f32.vlgmr.msra.gmra.mrb[0].mxu0 %v1390_v11 }
  0x13   :  { %1137 = vmatprep.mubr.msk.f32.mxu1 %vm1341_vm1, %v1342_v3  ;;  %1267 = vmatpush3.bf16.msra.mxu0 %v1266_v37 }
  0x14   :  { %1157 = vmatprep.mubr.msk.f32.mxu0 %vm1341_vm1, %v1342_v3  ;;  %1268 = vmatprep.subr.bf16.mxu0 %v1340_v0 }
  0x16   :  { %1138 = vmatmul.mubr.f32.gmra.mrb[4].mxu1 %v127_v38 }
  0x17   :  { %1147 = vmatprep.mubr.msk.f32.mxu1 %vm1341_vm1, %v1342_v3 }
  0x1a   :  { %1148 = vmatmul.mubr.f32.vlgmr.msra.gmra.mrb[2].mxu1 %v1392_v15  ;;  %1158 = vmatmul.mubr.f32.vlgmr.msra.gmra.mrb[0].mxu0 %v104_v17 }
  0x1b   :  { %1150 = vmatprep.mubr.msk.f32.mxu1 %vm1341_vm1, %v1342_v3  ;;  %1160 = vmatprep.mubr.msk.f32.mxu0 %vm1341_vm1, %v1342_v3 }
  0x1c   :  { %1270 = vmatpush3.bf16.msra.mxu0 %v1260_v18 }
  0x1d   :  { %1271 = vmatprep.subr.bf16.mxu0 %v1340_v0 }
  0x1e   :  { %1151 = vmatmul.mubr.f32.gmra.mrb[4].mxu1 %v1395_v19  ;;  %1161 = vmatmul.mubr.f32.gmra.mrb[2].mxu0 %v114_v21 }
  0x1f   :  { %1211 = vmatprep.mubr.msk.f32.mxu1 %vm1341_vm1, %v1342_v3  ;;  %1163 = vmatprep.mubr.msk.f32.mxu0 %vm1341_vm1, %v1342_v3 }
  0x22   :  { %1164 = vmatmul.mubr.f32.gmra.mrb[4].mxu0 %v124_v27 }
  0x23   :  { %1170 = vmatprep.mubr.msk.f32.mxu0 %vm1341_vm1, %v1342_v3 }
  0x26   :  { %1171 = vmatmul.mubr.f32.vlgmr.msra.gmra.mrb[0].mxu0 %v105_v23 }
  0x27   :  { %1173 = vmatprep.mubr.msk.f32.mxu0 %vm1341_vm1, %v1342_v3  ;;  %1273 = vmatpush3.bf16.msra.mxu0 %v1272_v39 }
  0x28   :  { %1274 = vmatprep.subr.bf16.mxu0 %v1340_v0 }
  0x2a   :  { %1174 = vmatmul.mubr.f32.gmra.mrb[2].mxu0 %v115_v25 }
  0x2b   :  { %1176 = vmatprep.mubr.msk.f32.mxu0 %vm1341_vm1, %v1342_v3 }
  0x2e   :  { %1177 = vmatmul.mubr.f32.gmra.mrb[4].mxu0 %v125_v33 }
  0x2f   :  { %1183 = vmatprep.mubr.msk.f32.mxu0 %vm1341_vm1, %v1342_v3 }
  0x32   :  { %1184 = vmatmul.mubr.f32.vlgmr.msra.gmra.mrb[0].mxu0 %v1390_v11 }
  0x33   :  { %1186 = vmatprep.mubr.msk.f32.mxu0 %vm1341_vm1, %v1342_v3  ;;  %1276 = vmatpush3.bf16.msra.mxu0 %v1260_v18 }
  0x36   :  { %1187 = vmatmul.mubr.f32.gmra.mrb[2].mxu0 %v1392_v15 }
  0x37   :  { %1189 = vmatprep.mubr.msk.f32.mxu0 %vm1341_vm1, %v1342_v3 }
  0x3a   :  { %1190 = vmatmul.mubr.f32.gmra.mrb[4].mxu0 %v1395_v19 }
  0x3b   :  { %1196 = vmatprep.mubr.msk.f32.mxu0 %vm1341_vm1, %v1342_v3 }
  0x3e   :  { %1197 = vmatmul.mubr.f32.vlgmr.msra.gmra.mrb[0].mxu0 %v1390_v11 }
  0x3f   :  { %1199 = vmatprep.mubr.msk.f32.mxu0 %vm1341_vm1, %v1342_v3 }
  0x42   :  { %1200 = vmatmul.mubr.f32.gmra.mrb[2].mxu0 %v1392_v15 }
  0x43   :  { %1202 = vmatprep.mubr.msk.f32.mxu0 %vm1341_vm1, %v1342_v3 }
  0x46   :  { %1203 = vmatmul.mubr.f32.gmra.mrb[4].mxu0 %v1395_v19 }
  0x83   :  { %v589_v24 = vpop.permute.xlu0 %588 }
  0xe1   :  { %v109_v42 = vpop.f32.mrb[0].mxu1 }
  0xe2   :  { %v1133_v43 = vpop.f32.mrb[1].mxu1 }
  0xed   :  { %v216_v44 = vpop.f32.mrb[2].mxu1 }
  0xee   :  { %v1149_v45 = vpop.f32.mrb[3].mxu1 }
  0xf1   :  { %v222_v46 = vpop.f32.mrb[4].mxu1 }
  0xf2   :  { %v1152_v47 = vpop.f32.mrb[5].mxu1 }
 0x111   :  { %v565_v51 = vpop.f32.mrb[0].mxu0 }
 0x112   :  { %v1297_v52 = vadd.f32 %v565_v51, %v109_v42  ;;  %v1198_v53 = vpop.f32.mrb[1].mxu0 }
 0x114   :  { %v581_v55 = vmax.f32 %v1297_v52, 0.0 }
 0x115   :  { %v571_v56 = vpop.f32.mrb[2].mxu0 }
 0x116   :  { %v596_v57 = vand.u32 4294901760, %v581_v55  ;;  %v1298_v58 = vadd.f32 %v571_v56, %v216_v44  ;;  %v1201_v59 = vpop.f32.mrb[3].mxu0 }
 0x118   :  { %v675_v61 = vsub.f32 %v581_v55, %v596_v57  ;;  %v582_v62 = vmax.f32 %v1298_v58, 0.0 }
 0x119   :  { %v577_v63 = vpop.f32.mrb[4].mxu0 }
 0x11a   :  { %v676_v1 = vand.u32 4294901760, %v675_v61  ;;  %v599_v2 = vand.u32 4294901760, %v582_v62  ;;  %v1299_v4 = vadd.f32 %v577_v63, %v222_v46  ;;  %v1204_v5 = vpop.f32.mrb[5].mxu0 }
 0x11c   :  { %v1278_v7 = vpack.c.bf16 %v599_v2, %v596_v57  ;;  %v682_v8 = vsub.f32 %v582_v62, %v599_v2  ;;  %v583_v9 = vmax.f32 %v1299_v4, 0.0  ;;  %v677_v10 = vsub.f32 %v675_v61, %v676_v1 }
 0x11e   :  { %v683_v11 = vand.u32 4294901760, %v682_v8  ;;  %v602_v12 = vand.u32 4294901760, %v583_v9  ;;  %1279 = vmatpush3.bf16.msra.mxu1 %v1278_v7  ;;  %v1284_v13 = vpack.c.bf16 %v682_v8, %v675_v61  ;;  %v678_v18 = vand.u32 4294901760, %v677_v10 }
 0x11f   :  { %1209 = vmatprep.subr.mxu1 %v1342_v3 }
 0x120   :  { %v684_v15 = vsub.f32 %v682_v8, %v683_v11  ;;  %v689_v16 = vsub.f32 %v583_v9, %v602_v12  ;;  %v1290_v17 = vpack.c.bf16 %v683_v11, %v676_v1 }
 0x122   :  { %v685_v19 = vand.u32 4294901760, %v684_v15  ;;  %v690_v20 = vand.u32 4294901760, %v689_v16  ;;  %1210 = vmatpush3.msra.mxu1 %v602_v12 }
 0x123   :  { %1212 = vmatmul.mubr.f32.vlgmr.msra.gmra.mrb[6].mxu1 %v667_v14  ;;  %1280 = vmatprep.subr.bf16.mxu1 %v1340_v0 }
 0x124   :  { %v691_v21 = vsub.f32 %v689_v16, %v690_v20  ;;  %v1281_v22 = vpack.c.bf16 %v685_v19, %v678_v18  ;;  %1220 = vmatprep.mubr.msk.f32.mxu1 %vm1341_vm1, %v1342_v3 }
 0x126   :  { %1282 = vmatpush3.bf16.msra.mxu1 %v1281_v22  ;;  %v692_v23 = vand.u32 4294901760, %v691_v21 }
 0x127   :  { %1218 = vmatprep.subr.mxu1 %v1342_v3 }
 0x12a   :  { %1219 = vmatpush3.msra.mxu1 %v692_v23 }
 0x12b   :  { %1221 = vmatmul.mubr.f32.vlgmr.msra.gmra.mrb[6].mxu1 %v1454_v50  ;;  %1283 = vmatprep.subr.bf16.mxu1 %v1340_v0 }
 0x12c   :  { %1285 = vmatpush3.bf16.msra.mxu1 %v1284_v13  ;;  %1229 = vmatprep.mubr.msk.f32.mxu1 %vm1341_vm1, %v1342_v3 }
 0x12d   :  { %1227 = vmatprep.subr.mxu1 %v1342_v3 }
 0x130   :  { %1228 = vmatpush3.msra.mxu1 %v689_v16 }
 0x131   :  { %1286 = vmatprep.subr.bf16.mxu1 %v1340_v0 }
 0x133   :  { %1230 = vmatmul.mubr.f32.vlgmr.msra.gmra.mrb[6].mxu1 %v664_v54 }
 0x134   :  { %1288 = vmatpush3.bf16.msra.mxu1 %v1278_v7  ;;  %1238 = vmatprep.mubr.msk.f32.mxu1 %vm1341_vm1, %v1342_v3 }
 0x135   :  { %1236 = vmatprep.subr.mxu1 %v1342_v3 }
 0x138   :  { %1237 = vmatpush3.msra.mxu1 %v602_v12 }
 0x139   :  { %1289 = vmatprep.subr.bf16.mxu1 %v1340_v0 }
 0x13b   :  { %1239 = vmatmul.mubr.f32.vlgmr.msra.gmra.mrb[6].mxu1 %v665_v60 }
 0x13c   :  { %1291 = vmatpush3.bf16.msra.mxu1 %v1290_v17  ;;  %1247 = vmatprep.mubr.msk.f32.mxu1 %vm1341_vm1, %v1342_v3 }
 0x13d   :  { %1245 = vmatprep.subr.mxu1 %v1342_v3 }
 0x140   :  { %1246 = vmatpush3.msra.mxu1 %v690_v20 }
 0x141   :  { %1292 = vmatprep.subr.bf16.mxu1 %v1340_v0 }
 0x143   :  { %1248 = vmatmul.mubr.f32.vlgmr.msra.gmra.mrb[6].mxu1 %v1454_v50 }
 0x144   :  { %1294 = vmatpush3.bf16.msra.mxu1 %v1278_v7  ;;  %1256 = vmatprep.mubr.msk.f32.mxu1 %vm1341_vm1, %v1342_v3 }
 0x145   :  { %1254 = vmatprep.subr.mxu1 %v1342_v3 }
 0x148   :  { %1255 = vmatpush3.msra.mxu1 %v602_v12 }
 0x14b   :  { %1257 = vmatmul.mubr.f32.vlgmr.msra.gmra.mrb[6].mxu1 %v1454_v50 }
 0x21e   :  { %v1063_v25 = vpop.f32.mrb[6].mxu1 }
 0x21f   :  { %v1300_v26 = vadd.f32 %v1063_v25, %v589_v24  ;;  %v1258_v27 = vpop.f32.mrb[7].mxu1 }
 0x221   :  { %1068 = vst.msk [vmem:[%s1488_s4] sm:$0xf] %vm1067_vm4, %v1300_v26 }

</bundles_post_ra>
